<compile_context>
chip_gen: v7x
topology: tpu7x:2x2x1
jax: 0.10.0
libtpu: 0.0.40
codegen_flags: <defaults>
</compile_context>

<pallas_src>
import functools

import jax
import jax.numpy as jnp
from jax.experimental import pallas as pl
from jax.experimental.pallas import tpu as pltpu


def _round_up(n: int, m: int) -> int:
    return ((n + m - 1) // m) * m


def _pick_tile_b(batch: int, tile_b_max: int) -> int:
    """Batch tile size.

    The lane-dense (1, tile_b) output block requires tile_b to be a multiple of
    128.  For mid-sized batches we aim for >= 2 grid steps so both v7x
    TensorCores get work (the batch grid is the only sharding axis); the extra
    grid step is negligible overhead on single-TC v5e/v6e.
    """
    tile_b_max = max(128, (tile_b_max // 128) * 128)
    want = 128 * max(1, -(-batch // 256))     # ceil(batch / (2*128)) tiles of 128
    return min(tile_b_max, want)


def _value_mlp_kernel(x_ref, w1_ref, w2_ref, vec_ref, b3_ref, o_ref, *, matmul_dtype):
    # x_ref:   (tile_b, K)   observation tile, K = obs_dim (possibly sublane-padded)
    # w1_ref:  (K, Hp)       layer-1 weights, Hp = hidden padded to 128 lanes
    # w2_ref:  (Hp, Hp)      layer-2 weights (zero rows/cols beyond hidden)
    # vec_ref: (8, Hp) f32   row 0 = w3, row 1 = b1, row 2 = b2
    # b3_ref:  (1,) f32      scalar output bias, SMEM
    # o_ref:   (1, tile_b)   lane-dense value row for this tile
    md = matmul_dtype

    x = x_ref[...]
    if x.dtype != md:
        x = x.astype(md)
    w1 = w1_ref[...]
    w2 = w2_ref[...]
    w3_row = vec_ref[0:1, :].astype(md)       # (1, Hp)
    b1 = vec_ref[1:2, :]                      # (1, Hp) f32
    b2 = vec_ref[2:3, :]                      # (1, Hp) f32

    # Layers 1 + 2: MXU matmuls with f32 accumulation; bias/tanh stay f32.
    h1 = jnp.tanh(jnp.dot(x, w1, preferred_element_type=jnp.float32) + b1)
    h2 = jnp.tanh(jnp.dot(h1.astype(md), w2, preferred_element_type=jnp.float32) + b2)

    # Final layer: contract w3 (1, Hp) against h2 (tile_b, Hp) over the last dim
    # of both, folding the transpose into the MXU operand feed and producing the
    # lane-dense (1, tile_b) result directly.
    v = jax.lax.dot_general(
        w3_row, h2.astype(md),
        dimension_numbers=(((1,), (1,)), ((), ())),
        preferred_element_type=jnp.float32,
    ) + b3_ref[0]
    o_ref[...] = v                            # (1, tile_b)


def init_value_params(key, obs_dim, hidden, matmul_dtype=jnp.float32):
    """Builds the resident parameter planes for the value MLP."""
    sublane = 16 if matmul_dtype == jnp.bfloat16 else 8
    K = _round_up(obs_dim, sublane)           # contraction dim (no-op when obs_dim % 8 == 0)
    Hp = _round_up(hidden, 128)               # lane-dense hidden width

    k1, k2, k3, k4, k5, k6 = jax.random.split(key, 6)
    s1 = 1.0 / jnp.sqrt(jnp.float32(obs_dim))
    s2 = 1.0 / jnp.sqrt(jnp.float32(hidden))

    w1 = jax.random.uniform(k1, (obs_dim, hidden), jnp.float32, -s1, s1)
    b1 = jax.random.uniform(k4, (hidden,), jnp.float32, -s1, s1)
    w2 = jax.random.uniform(k2, (hidden, hidden), jnp.float32, -s2, s2)
    b2 = jax.random.uniform(k5, (hidden,), jnp.float32, -s2, s2)
    w3 = jax.random.uniform(k3, (hidden,), jnp.float32, -s2, s2)   # Linear(H -> 1)
    b3 = jax.random.uniform(k6, (1,), jnp.float32, -s2, s2)

    W1 = jnp.zeros((K, Hp), jnp.float32).at[:obs_dim, :hidden].set(w1).astype(matmul_dtype)
    W2 = jnp.zeros((Hp, Hp), jnp.float32).at[:hidden, :hidden].set(w2).astype(matmul_dtype)
    vec = jnp.zeros((8, Hp), jnp.float32)
    vec = vec.at[0, :hidden].set(w3)
    vec = vec.at[1, :hidden].set(b1)
    vec = vec.at[2, :hidden].set(b2)

    return {"w1": W1, "w2": W2, "vec": vec, "b3": b3,
            "obs_dim": obs_dim, "hidden": hidden}


def value_forward(observation, params, *, tile_b_max=512):
    """ValueLearningAgent.forward: obs (obs_dim,) or (B, obs_dim) -> values (B, 1)."""
    obs = jnp.asarray(observation, jnp.float32)          # torch .float()
    if obs.ndim == 1:
        obs = obs[None, :]                               # torch .unsqueeze(0)
    B, obs_dim = obs.shape
    assert obs_dim == params["obs_dim"]

    w1, w2, vec, b3 = params["w1"], params["w2"], params["vec"], params["b3"]
    md = w1.dtype
    K, Hp = w1.shape

    tile_b = _pick_tile_b(B, tile_b_max)
    b_pad = _round_up(B, tile_b)
    num_tiles = b_pad // tile_b

    # Stream observations in the matmul dtype (bf16 path halves x HBM bytes);
    # f32 path keeps the exact torch f32 Linear semantics.
    stream_dtype = jnp.bfloat16 if md == jnp.bfloat16 else jnp.float32
    x = obs.astype(stream_dtype)
    pad_rows, pad_cols = b_pad - B, K - obs_dim
    if pad_rows or pad_cols:
        # Zero-pad the batch tail (and any sublane pad of the feature dim) so no
        # uninitialized HBM rows flow through the kernel, even transiently.
        x = jnp.pad(x, ((0, pad_rows), (0, pad_cols)))

    kernel = functools.partial(_value_mlp_kernel, matmul_dtype=md)
    out = pl.pallas_call(
        kernel,
        out_shape=jax.ShapeDtypeStruct((1, b_pad), jnp.float32),
        grid=(num_tiles,),
        in_specs=[
            # streaming observation tiles: (tile_b, obs_dim) — the only HBM stream
            pl.BlockSpec((tile_b, K), lambda i: (i, 0)),
            # resident weight planes: constant block index -> single DMA each
            pl.BlockSpec((K, Hp), lambda i: (0, 0)),
            pl.BlockSpec((Hp, Hp), lambda i: (0, 0)),
            pl.BlockSpec((8, Hp), lambda i: (0, 0)),
            # scalar output bias in SMEM (no VMEM tile / DMA channel)
            pl.BlockSpec(memory_space=pltpu.MemorySpace.SMEM),
        ],
        out_specs=pl.BlockSpec((1, tile_b), lambda i: (0, i)),
        compiler_params=pltpu.CompilerParams(
            dimension_semantics=("parallel",),
        ),
    )(x, w1, w2, vec, b3)

    return out[0, :B][:, None]                            # (B, 1)


def value_forward_ref(observation, params):
    """Pure-JAX reference mirroring the kernel math (same packing / casts /
    default matmul precision)."""
    obs = jnp.asarray(observation, jnp.float32)
    if obs.ndim == 1:
        obs = obs[None, :]
    w1, w2, vec, b3 = params["w1"], params["w2"], params["vec"], params["b3"]
    md = w1.dtype
    K = w1.shape[0]
    B, obs_dim = obs.shape

    x = jnp.pad(obs, ((0, 0), (0, K - obs_dim)))
    stream_dtype = jnp.bfloat16 if md == jnp.bfloat16 else jnp.float32
    x = x.astype(stream_dtype).astype(md)

    w3_row = vec[0:1, :].astype(md)
    b1 = vec[1:2, :]
    b2 = vec[2:3, :]

    h1 = jnp.tanh(jnp.dot(x, w1, preferred_element_type=jnp.float32) + b1)
    h2 = jnp.tanh(jnp.dot(h1.astype(md), w2, preferred_element_type=jnp.float32) + b2)
    v = jnp.dot(h2.astype(md), w3_row.T, preferred_element_type=jnp.float32) + b3[0]
    return v                                              # (B, 1)


if __name__ == "__main__":
    OBS_DIM = 32
    HIDDEN = 32
    BATCH = 200      # non-multiple of 128 -> exercises batch-tail padding, grid=2

    key = jax.random.PRNGKey(0)
    pkey, okey, okey2 = jax.random.split(key, 3)
    obs_batch = jax.random.normal(okey, (BATCH, OBS_DIM), jnp.float32)

    # --- float32 path (exact semantics of the original module) ---
    params_f32 = init_value_params(pkey, OBS_DIM, HIDDEN, jnp.float32)
    v = value_forward(obs_batch, params_f32)
    jax.block_until_ready(v)
    v_ref = value_forward_ref(obs_batch, params_f32)
    assert v.shape == (BATCH, 1)
    assert jnp.allclose(v, v_ref, atol=1e-4, rtol=1e-4), float(jnp.max(jnp.abs(v - v_ref)))

    # --- single-observation path (original forward: unsqueeze(0) -> (1, 1) value) ---
    v1 = value_forward(obs_batch[0], params_f32)
    jax.block_until_ready(v1)
    assert v1.shape == (1, 1)
    assert jnp.allclose(v1, v_ref[0:1], atol=1e-4, rtol=1e-4)

    # --- larger batch: exercises the enlarged (512-row) tile and 2-step grid ---
    obs_big = jax.random.normal(okey2, (1000, OBS_DIM), jnp.float32)
    vbig = value_forward(obs_big, params_f32)
    jax.block_until_ready(vbig)
    vbig_ref = value_forward_ref(obs_big, params_f32)
    assert vbig.shape == (1000, 1)
    assert jnp.allclose(vbig, vbig_ref, atol=1e-4, rtol=1e-4), \
        float(jnp.max(jnp.abs(vbig - vbig_ref)))

    # --- bf16 MXU/stream path (v6e/v7x recommendation; accumulation/tanh/biases f32) ---
    params_bf16 = init_value_params(pkey, OBS_DIM, HIDDEN, jnp.bfloat16)
    vb = value_forward(obs_batch, params_bf16)
    jax.block_until_ready(vb)
    vb_ref = value_forward_ref(obs_batch, params_bf16)
    assert jnp.allclose(vb, vb_ref, atol=5e-3, rtol=5e-3), float(jnp.max(jnp.abs(vb - vb_ref)))

    print("KERNEL_OK")
</pallas_src>

<mosaic_0001>
module attributes {stable_mosaic.version = 11 : i64} {
  func.func @_value_mlp_kernel(%arg0: i32, %arg1: memref<128x32xf32, #tpu.memory_space<vmem>>, %arg2: memref<32x128xf32, #tpu.memory_space<vmem>>, %arg3: memref<128x128xf32, #tpu.memory_space<vmem>>, %arg4: memref<8x128xf32, #tpu.memory_space<vmem>>, %arg5: memref<1xf32, #tpu.memory_space<smem>>, %arg6: memref<1x128xf32, #tpu.memory_space<vmem>>) attributes {dimension_semantics = [#tpu.dimension_semantics<parallel>], iteration_bounds = array<i64: 2>, scalar_prefetch = 0 : i64, scratch_operands = 0 : i64, tpu.core_type = #tpu.core_type<tc>, window_params = [{transform_indices = @transform_0, window_bounds = array<i64: 128, 32>}, {pipeline_mode = #tpu.pipeline_mode<synchronous>, transform_indices = @transform_1, window_bounds = array<i64: 32, 128>}, {pipeline_mode = #tpu.pipeline_mode<synchronous>, transform_indices = @transform_2, window_bounds = array<i64: 128, 128>}, {pipeline_mode = #tpu.pipeline_mode<synchronous>, transform_indices = @transform_3, window_bounds = array<i64: 8, 128>}, {transform_indices = @transform_4, window_bounds = array<i64: 1>}, {transform_indices = @transform_5, window_bounds = array<i64: 1, 128>}]} {
    %c0 = arith.constant 0 : index
    %c0_0 = arith.constant 0 : index
    %0 = vector.load %arg1[%c0, %c0_0] : memref<128x32xf32, #tpu.memory_space<vmem>>, vector<128x32xf32>
    %c0_1 = arith.constant 0 : index
    %c0_2 = arith.constant 0 : index
    %1 = vector.load %arg2[%c0_1, %c0_2] : memref<32x128xf32, #tpu.memory_space<vmem>>, vector<32x128xf32>
    %c0_3 = arith.constant 0 : index
    %c0_4 = arith.constant 0 : index
    %2 = vector.load %arg3[%c0_3, %c0_4] : memref<128x128xf32, #tpu.memory_space<vmem>>, vector<128x128xf32>
    %c0_5 = arith.constant 0 : index
    %c0_6 = arith.constant 0 : index
    %3 = vector.load %arg4[%c0_5, %c0_6] : memref<8x128xf32, #tpu.memory_space<vmem>>, vector<1x128xf32>
    %c1 = arith.constant 1 : index
    %c0_7 = arith.constant 0 : index
    %4 = vector.load %arg4[%c1, %c0_7] : memref<8x128xf32, #tpu.memory_space<vmem>>, vector<1x128xf32>
    %c2 = arith.constant 2 : index
    %c0_8 = arith.constant 0 : index
    %5 = vector.load %arg4[%c2, %c0_8] : memref<8x128xf32, #tpu.memory_space<vmem>>, vector<1x128xf32>
    %cst = arith.constant dense<0.000000e+00> : vector<128x128xf32>
    %6 = tpu.matmul %0, %1, %cst {dimension_numbers = #tpu.dot_dimension_numbers<[1], [0], [0], [1], [0, 0, 1, 1], [], []>} : vector<128x32xf32>, vector<32x128xf32>, vector<128x128xf32> -> vector<128x128xf32>
    %7 = vector.broadcast %4 : vector<1x128xf32> to vector<128x128xf32>
    %8 = arith.addf %6, %7 : vector<128x128xf32>
    %9 = math.tanh %8 : vector<128x128xf32>
    %cst_9 = arith.constant dense<0.000000e+00> : vector<128x128xf32>
    %10 = tpu.matmul %9, %2, %cst_9 {dimension_numbers = #tpu.dot_dimension_numbers<[1], [0], [0], [1], [0, 0, 1, 1], [], []>} : vector<128x128xf32>, vector<128x128xf32>, vector<128x128xf32> -> vector<128x128xf32>
    %11 = vector.broadcast %5 : vector<1x128xf32> to vector<128x128xf32>
    %12 = arith.addf %10, %11 : vector<128x128xf32>
    %13 = math.tanh %12 : vector<128x128xf32>
    %cst_10 = arith.constant dense<0.000000e+00> : vector<1x128xf32>
    %14 = tpu.matmul %3, %13, %cst_10 {dimension_numbers = #tpu.dot_dimension_numbers<[1], [1], [0], [0], [0, 0, 1, 0], [], []>} : vector<1x128xf32>, vector<128x128xf32>, vector<1x128xf32> -> vector<1x128xf32>
    %c0_11 = arith.constant 0 : index
    %15 = memref.load %arg5[%c0_11] : memref<1xf32, #tpu.memory_space<smem>>
    %16 = vector.broadcast %15 : f32 to vector<1x128xf32>
    %17 = arith.addf %14, %16 : vector<1x128xf32>
    %c0_12 = arith.constant 0 : index
    %c0_13 = arith.constant 0 : index
    %18 = vector.load %arg6[%c0_12, %c0_13] : memref<1x128xf32, #tpu.memory_space<vmem>>, vector<1x128xf32>
    tpu.vector_store %arg6[%c0_12, %c0_13], %17 {strides = array<i32>} : memref<1x128xf32, #tpu.memory_space<vmem>>, vector<1x128xf32>,
    return
  }
  func.func @transform_0(%arg0: i32) -> (i32, i32) {
    %c0_i32 = arith.constant 0 : i32
    %c0_i32_0 = arith.constant 0 : i32
    return %arg0, %c0_i32 : i32, i32
  }
  func.func @transform_1(%arg0: i32) -> (i32, i32) {
    %c0_i32 = arith.constant 0 : i32
    %c0_i32_0 = arith.constant 0 : i32
    %c0_i32_1 = arith.constant 0 : i32
    return %c0_i32, %c0_i32_0 : i32, i32
  }
  func.func @transform_2(%arg0: i32) -> (i32, i32) {
    %c0_i32 = arith.constant 0 : i32
    %c0_i32_0 = arith.constant 0 : i32
    %c0_i32_1 = arith.constant 0 : i32
    return %c0_i32, %c0_i32_0 : i32, i32
  }
  func.func @transform_3(%arg0: i32) -> (i32, i32) {
    %c0_i32 = arith.constant 0 : i32
    %c0_i32_0 = arith.constant 0 : i32
    %c0_i32_1 = arith.constant 0 : i32
    return %c0_i32, %c0_i32_0 : i32, i32
  }
  func.func @transform_4(%arg0: i32) -> i32 {
    %c0_i32 = arith.constant 0 : i32
    %c0_i32_0 = arith.constant 0 : i32
    return %c0_i32 : i32
  }
  func.func @transform_5(%arg0: i32) -> (i32, i32) {
    %c0_i32 = arith.constant 0 : i32
    %c0_i32_0 = arith.constant 0 : i32
    return %c0_i32, %arg0 : i32, i32
  }
}

</mosaic_0001>

<bundles_post_ra>
// kernel: tpu_custom_call.1
= control target key start
LH: loop header
LB: loop body
LE: loop exit
PB: predicated region body
PF: predicated region fallthrough
CT: control target
= control target key end

     0   :  { %s1520_s0 = inlined_call_operand.vmem [shape: f32[256,32], index: 0, kind: input, shape index: {}]   ;;  %s1521_s1 = inlined_call_operand.vmem [shape: f32[32,128], index: 1, kind: input, shape index: {}]   ;;  %s1522_s2 = inlined_call_operand.vmem [shape: f32[128,128], index: 2, kind: input, shape index: {}]   ;;  %s1523_s3 = inlined_call_operand.vmem [shape: f32[8,128], index: 3, kind: input, shape index: {}]   ;;  %s1524_s4 = inlined_call_operand.<no memory space> [shape: f32[1], index: 4, kind: input, shape index: {}]   ;;  %s1525_s5 = inlined_call_operand.hbm [shape: f32[1,256], index: 5, kind: output, shape index: {}]  }
   0x1   :  { %10 = sst [smem:[#allocation2]] %s1524_s4 }
   0x2   :  { %11 = vsyncpa [#allocation4], 0 }
   0x3   :  { %13 = vsyncpa [#allocation4 + $0x1], 0  ;;  %s1274_s20 = smov 0   ;;  %s1276_s21 = smov 0  }
   0x4   :  { %s1278_s22 = smov 0   ;;  %s1280_s23 = smov 0  }
   0x5 LB: > { %s783_s4 = sadd.s32 4294967295, %s1235_s23   ;;  %s784_s24 = sadd.s32 4294967294, %s1235_s23   ;;  %s1235_s23 = sphi %s1280_s23, %s1531_s23   ;;  %s1231_s22 = sphi %s1278_s22, %s1530_s22   ;;  %s1227_s21 = sphi %s1276_s21, %s1529_s21   ;;  %s1223_s20 = sphi %s1274_s20, %s1528_s20  }
   0x6   : > { %s1297_s25 = sadd.s32 1, %s1235_s23   ;;  %s136_s26 = sadd.s32 1, %s1231_s22 }
   0x7   : > { %s133_s27 = ssub.s32 %s1235_s23, %s1297_s25  ;;  %p146_p0 = scmp.ne.s32.totalorder %s1231_s22, %s1227_s21 }
   0x8   : > { %p134_p1 = scmp.eq.s32.totalorder %s133_s27, 0  ;;  %p147_p2 = scmp.eq.s32.totalorder %s783_s4, 1 }
   0x9   : > { %p152_p3 = scmp.ne.s32.totalorder %s1227_s21, %s1223_s20  ;;  %p153_p4 = scmp.eq.s32.totalorder %s784_s24, 1 }
   0xa   : > { %s1307_s28 = scalar_select %p134_p1, %s1231_s22, %s136_s26  }
   0xb   : > { %p1309_p5 = por %p147_p2, %p146_p0  ;;  %p1313_p6 = por %p153_p4, %p152_p3 }
   0xc   : > { %p787_p7 = scmp.ge.s32.totalorder %s1235_s23, 1  ;;  %p192_p8 = scmp.lt.s32.totalorder %s1235_s23, 3 }
   0xe   : > { %p193_p9 = pnand %p787_p7, %p192_p8 }
   0xf   : > { %v241_v0 = vld [vmem:[%s1521_s1] sm:$0xff] (!%p193_p9)  ;;  %v242_v1 = vld [vmem:[%s1521_s1 + $0x8] sm:$0xff] (!%p193_p9)  ;;  %v243_v2 = vld [vmem:[%s1521_s1 + $0x10] sm:$0xff] (!%p193_p9)  ;;  %s1328_s12 = sshll.u32 (!%p193_p9), %s783_s4, 4  ;;  %vm268_vm0 = vcmask (!%p193_p9), 261120   ;;  %vm1238_vm1 = vmmov (!%p193_p9), 0  }
  0x10   : > { %196 = sbr.rel (%p193_p9) target bundleno = 775 (0x307), region = 40  ;;  %v1003_v3 = vpack.c.bf16 (!%p193_p9), %v242_v1, %v241_v0  ;;  %v244_v4 = vld [vmem:[%s1521_s1 + $0x18] sm:$0xff] (!%p193_p9)  ;;  %p220_p10 = scmp.lt.s32.totalorder (!%p193_p9), %s1328_s12, 31  ;;  %v245_v6 = vld [vmem:[%s1522_s2] sm:$0xff] (!%p193_p9)  ;;  %v246_v7 = vld [vmem:[%s1522_s2 + $0x8] sm:$0xff] (!%p193_p9) }
  0x11   : > { %v1007_v5 = vpack.c.bf16 (!%p193_p9), %v244_v4, %v243_v2  ;;  %v1011_v8 = vpack.c.bf16 (!%p193_p9), %v246_v7, %v245_v6  ;;  %v247_v9 = vld [vmem:[%s1522_s2 + $0x10] sm:$0xff] (!%p193_p9)  ;;  %v248_v10 = vld [vmem:[%s1522_s2 + $0x18] sm:$0xff] (!%p193_p9)  ;;  %v249_v15 = vld [vmem:[%s1522_s2 + $0x20] sm:$0xff] (!%p193_p9)  ;;  %s643_s7 = sld [smem:[#allocation2]] (!%p193_p9)  ;;  %s217_s8 = sand.u32 (!%p193_p9), 1, %s1227_s21  }
  0x12   : > { %1004 = vmatprep.subr.bf16.mxu1 (!%p193_p9), %v1003_v3  ;;  %v1015_v14 = vpack.c.bf16 (!%p193_p9), %v248_v10, %v247_v9  ;;  %v250_v16 = vld [vmem:[%s1522_s2 + $0x28] sm:$0xff] (!%p193_p9)  ;;  %v251_v20 = vld [vmem:[%s1522_s2 + $0x30] sm:$0xff] (!%p193_p9)  ;;  %v252_v21 = vld [vmem:[%s1522_s2 + $0x38] sm:$0xff] (!%p193_p9)  ;;  %s218_s9 = scalar_lea.vmem (!%p193_p9), [#allocation3], %s217_s8  ;;  %s1478_s14 = scalar_lea.hbm (!%p193_p9), %s1525_s5, %s1328_s12 }
  0x13   : > { %1006 = vmatpush3.bf16.msra.mxu1 (!%p193_p9), %v1003_v3  ;;  %v1019_v19 = vpack.c.bf16 (!%p193_p9), %v250_v16, %v249_v15  ;;  %v1023_v24 = vpack.c.bf16 (!%p193_p9), %v252_v21, %v251_v20  ;;  %v253_v25 = vld [vmem:[%s1522_s2 + $0x40] sm:$0xff] (!%p193_p9)  ;;  %v254_v26 = vld [vmem:[%s1522_s2 + $0x48] sm:$0xff] (!%p193_p9)  ;;  %v255_v37 = vld [vmem:[%s1522_s2 + $0x50] sm:$0xff] (!%p193_p9)  ;;  %s729_s10 = sshll.u32 (!%p193_p9), %s218_s9, 4  ;;  %s1240_s16 = smov (!%p193_p9), [#allocation3]   ;;  %s1480_s10 = int_to_ptr.vmem [resolvable:$true] %s729_s10 }
  0x14   : > { %1008 = vmatprep.subr.bf16.mxu1 (!%p193_p9), %v1007_v5  ;;  %v1027_v29 = vpack.c.bf16 (!%p193_p9), %v254_v26, %v253_v25  ;;  %v256_v38 = vld [vmem:[%s1522_s2 + $0x58] sm:$0xff] (!%p193_p9)  ;;  %v257_v40 = vld [vmem:[%s1522_s2 + $0x60] sm:$0xff] (!%p193_p9)  ;;  %v258_v41 = vld [vmem:[%s1522_s2 + $0x68] sm:$0xff] (!%p193_p9)  ;;  %s1173_s15 = scalar_lea.vmem (!%p193_p9), %s1480_s10, 16  ;;  %s1177_s17 = sshll.u32 (!%p193_p9), %s1240_s16, 4  ;;  %s1178_s17 = int_to_ptr.vmem [resolvable:$false] %s1177_s17 }
  0x15   : > { %v1031_v39 = vpack.c.bf16 (!%p193_p9), %v256_v38, %v255_v37  ;;  %v1035_v42 = vpack.c.bf16 (!%p193_p9), %v258_v41, %v257_v40  ;;  %v259_v43 = vld [vmem:[%s1522_s2 + $0x70] sm:$0xff] (!%p193_p9)  ;;  %v260_v44 = vld [vmem:[%s1522_s2 + $0x78] sm:$0xff] (!%p193_p9)  ;;  %v1423_v46 = vld [vmem:[%s1523_s3 + $0x1] ss:$0 sm:$0xff] (!%p193_p9)  ;;  %p1174_p11 = scmp.ne.s32.totalorder (!%p193_p9), %s1480_s10, %s1173_s15  ;;  %s1179_s18 = scalar_lea.vmem (!%p193_p9), %s1178_s17, 32 }
  0x16   : > { %v1039_v45 = vpack.c.bf16 (!%p193_p9), %v260_v44, %v259_v43  ;;  %p1180_p0 = scmp.lt.s32.totalorder (!%p193_p9), %s1480_s10, %s1178_s17  ;;  %p1181_p1 = scmp.lt.s32.totalorder (!%p193_p9), %s1179_s18, %s1173_s15 }
  0x17   : > { %s221_s19 = scalar_select %p220_p10, %s1328_s12, 31  ;;  %1010 = vmatpush3.bf16.msra.mxu1 %v1007_v5 }
  0x18   : > { %1012 = vmatprep.subr.bf16.mxu1 %v1011_v8  ;;  %p1175_p12 = pnand %p1174_p11, %p1309_p5  ;;  %p1182_p2 = por %p1181_p1, %p1180_p0 }
  0x19   : > { %s789_s4 = sshll.u32 %s221_s19, 3 }
  0x1a   : > { %s1344_s27 = scalar_lea.vmem %s1520_s0, %s789_s4  ;;  %p1176_p13 = pneg %p1175_p12 }
  0x1b   : > { %v225_v11 = vld [vmem:[%s1344_s27] sm:$0xff]  ;;  %v226_v12 = vld [vmem:[%s1344_s27 + $0x8] sm:$0xff]  ;;  %v227_v13 = vld [vmem:[%s1344_s27 + $0x10] sm:$0xff] }
  0x1c   : > { %888 = vmatprep.mubr.msk.f32.mxu1 %vm268_vm0, %v225_v11  ;;  %v228_v17 = vld [vmem:[%s1344_s27 + $0x18] sm:$0xff]  ;;  %v229_v18 = vld [vmem:[%s1344_s27 + $0x20] sm:$0xff]  ;;  %v230_v22 = vld [vmem:[%s1344_s27 + $0x28] sm:$0xff]  ;;  %p1183_p3 = pnand %p1182_p2, %p1176_p13 }
  0x1d   : > { %889 = vmatmul.mubr.msk.f32.vlgmr.msra.gmra.mrb[0].mxu1 %vm268_vm0, %v226_v12  ;;  %v231_v23 = vld [vmem:[%s1344_s27 + $0x30] sm:$0xff]  ;;  %v232_v27 = vld [vmem:[%s1344_s27 + $0x38] sm:$0xff]  ;;  %v233_v28 = vld [vmem:[%s1344_s27 + $0x40] sm:$0xff] }
  0x1e   : > { %891 = vmatprep.mubr.msk.f32.mxu1 %vm268_vm0, %v227_v13  ;;  %1014 = vmatpush3.bf16.msra.mxu1 %v1011_v8  ;;  %v234_v30 = vld [vmem:[%s1344_s27 + $0x48] sm:$0xff]  ;;  %v235_v31 = vld [vmem:[%s1344_s27 + $0x50] sm:$0xff]  ;;  %v236_v32 = vld [vmem:[%s1344_s27 + $0x58] sm:$0xff] }
  0x1f   : > { %1016 = vmatprep.subr.bf16.mxu1 %v1015_v14  ;;  %v237_v33 = vld [vmem:[%s1344_s27 + $0x60] sm:$0xff]  ;;  %v238_v34 = vld [vmem:[%s1344_s27 + $0x68] sm:$0xff]  ;;  %v239_v35 = vld [vmem:[%s1344_s27 + $0x70] sm:$0xff] }
  0x20   : > { %v240_v36 = vld [vmem:[%s1344_s27 + $0x78] sm:$0xff]  ;;  %s717_s27 = scalar_lea.sflag [#allocation4], %s217_s8 }
  0x21   : > { %892 = vmatmul.mubr.msk.f32.gmra.mrb[2].mxu1 %vm268_vm0, %v228_v17 }
  0x22   : > { %894 = vmatprep.mubr.msk.f32.mxu1 %vm268_vm0, %v229_v18  ;;  %1018 = vmatpush3.bf16.msra.mxu1 %v1015_v14 }
  0x23   : > { %1020 = vmatprep.subr.bf16.mxu1 %v1019_v19 }
  0x25   : > { %895 = vmatmul.mubr.msk.f32.gmra.mrb[4].mxu1 %vm268_vm0, %v230_v22 }
  0x26   : > { %897 = vmatprep.mubr.msk.f32.mxu1 %vm268_vm0, %v231_v23  ;;  %1022 = vmatpush3.bf16.msra.mxu1 %v1019_v19 }
  0x27   : > { %1024 = vmatprep.subr.bf16.mxu1 %v1023_v24 }
  0x29   : > { %898 = vmatmul.mubr.msk.f32.gmra.mrb[6].mxu1 %vm268_vm0, %v232_v27 }
  0x2a   : > { %900 = vmatprep.mubr.msk.f32.mxu1 %vm268_vm0, %v233_v28  ;;  %1026 = vmatpush3.bf16.msra.mxu1 %v1023_v24 }
  0x2b   : > { %1028 = vmatprep.subr.bf16.mxu1 %v1027_v29 }
  0x2d   : > { %901 = vmatmul.mubr.msk.f32.gmra.mrb[8].mxu1 %vm268_vm0, %v234_v30 }
  0x2e   : > { %903 = vmatprep.mubr.msk.f32.mxu1 %vm268_vm0, %v235_v31  ;;  %1030 = vmatpush3.bf16.msra.mxu1 %v1027_v29  ;;  %v1237_v31 = vmov 0.0|0.0  }
  0x2f   : > { %1032 = vmatprep.subr.bf16.mxu1 %v1031_v39  ;;  %1043 = vmatprep.subr.bf16.mxu0 %v1237_v31 }
  0x31   : > { %904 = vmatmul.mubr.msk.f32.gmra.mrb[10].mxu1 %vm268_vm0, %v236_v32  ;;  %v1239_v32 = vmov 0.0  }
  0x32   : > { %906 = vmatprep.mubr.msk.f32.mxu1 %vm268_vm0, %v237_v33  ;;  %1034 = vmatpush3.bf16.msra.mxu1 %v1031_v39  ;;  %v1445_v33 = vld [vmem:[%s1523_s3 + $0x2] ss:$0 sm:$0xff] }
  0x33   : > { %1036 = vmatprep.subr.bf16.mxu1 %v1035_v42  ;;  %1000 = vmatprep.mubr.msk.f32.mxu0 %vm1238_vm1, %v1239_v32 }
  0x35   : > { %907 = vmatmul.mubr.msk.f32.gmra.mrb[12].mxu1 %vm268_vm0, %v238_v34 }
  0x36   : > { %909 = vmatprep.mubr.msk.f32.mxu1 %vm268_vm0, %v239_v35  ;;  %1038 = vmatpush3.bf16.msra.mxu1 %v1035_v42 }
  0x37   : > { %1040 = vmatprep.subr.bf16.mxu1 %v1039_v45 }
  0x39   : > { %910 = vmatmul.mubr.msk.f32.gmra.mrb[14].mxu1 %vm268_vm0, %v240_v36 }
  0x3a   : > { %1042 = vmatpush3.bf16.msra.mxu1 %v1039_v45 }
  0xf0   : > { %v890_v47 = vpop.f32.mrb[0].mxu1 }
  0xf1   : > { %v389_v48 = vadd.f32 %v890_v47, %v1423_v46  ;;  %v383_v49 = vpop.f32.mrb[1].mxu1 }
  0xf2   : > { %v384_v50 = vadd.f32 %v1423_v46, %v383_v49 }
  0xf4   : > { %1109 = vtanh.f32 %v384_v50  ;;  %v893_v51 = vpop.f32.mrb[2].mxu1 }
  0xf5   : > { %1111 = vtanh.f32 %v389_v48  ;;  %v399_v52 = vadd.f32 %v893_v51, %v1423_v46  ;;  %v393_v53 = vpop.f32.mrb[3].mxu1 }
  0xf6   : > { %v394_v54 = vadd.f32 %v1423_v46, %v393_v53 }
  0xf7   : > { %1113 = vtanh.f32 %v399_v52 }
  0xf8   : > { %1115 = vtanh.f32 %v394_v54  ;;  %v896_v55 = vpop.f32.mrb[4].mxu1 }
  0xf9   : > { %v409_v56 = vadd.f32 %v896_v55, %v1423_v46  ;;  %v403_v57 = vpop.f32.mrb[5].mxu1 }
  0xfa   : > { %v404_v58 = vadd.f32 %v1423_v46, %v403_v57 }
  0xfb   : > { %1117 = vtanh.f32 %v409_v56 }
  0xfc   : > { %1119 = vtanh.f32 %v404_v58  ;;  %v899_v59 = vpop.f32.mrb[6].mxu1 }
  0xfd   : > { %v419_v60 = vadd.f32 %v899_v59, %v1423_v46  ;;  %v413_v61 = vpop.f32.mrb[7].mxu1 }
  0xfe   : > { %v1110_v62 = vpop.eup %1109  ;;  %v414_v63 = vadd.f32 %v1423_v46, %v413_v61 }
  0xff   : > { %v1112_v0 = vpop.eup %1111  ;;  %944 = vmatprep.mubr.f32.mxu1 %v1110_v62  ;;  %1121 = vtanh.f32 %v419_v60 }
 0x100   : > { %945 = vmatmul.mubr.f32.vlgmr.msra.gmra.mrb[16].mxu1 %v1112_v0  ;;  %1123 = vtanh.f32 %v414_v63  ;;  %v902_v1 = vpop.f32.mrb[8].mxu1 }
 0x101   : > { %v1114_v2 = vpop.eup %1113  ;;  %v429_v3 = vadd.f32 %v902_v1, %v1423_v46  ;;  %v423_v4 = vpop.f32.mrb[9].mxu1 }
 0x102   : > { %v1116_v5 = vpop.eup %1115  ;;  %v424_v6 = vadd.f32 %v1423_v46, %v423_v4 }
 0x103   : > { %947 = vmatprep.mubr.f32.mxu1 %v1116_v5  ;;  %1125 = vtanh.f32 %v429_v3 }
 0x104   : > { %948 = vmatmul.mubr.f32.gmra.mrb[18].mxu1 %v1114_v2  ;;  %1127 = vtanh.f32 %v424_v6  ;;  %v905_v7 = vpop.f32.mrb[10].mxu1 }
 0x105   : > { %v1118_v8 = vpop.eup %1117  ;;  %v439_v9 = vadd.f32 %v905_v7, %v1423_v46  ;;  %v433_v10 = vpop.f32.mrb[11].mxu1 }
 0x106   : > { %v1120_v11 = vpop.eup %1119  ;;  %v434_v12 = vadd.f32 %v1423_v46, %v433_v10 }
 0x107   : > { %950 = vmatprep.mubr.f32.mxu1 %v1120_v11  ;;  %1129 = vtanh.f32 %v439_v9 }
 0x108   : > { %951 = vmatmul.mubr.f32.gmra.mrb[20].mxu1 %v1118_v8  ;;  %1131 = vtanh.f32 %v434_v12  ;;  %v908_v13 = vpop.f32.mrb[12].mxu1 }
 0x109   : > { %v1122_v14 = vpop.eup %1121  ;;  %v449_v15 = vadd.f32 %v908_v13, %v1423_v46  ;;  %v443_v16 = vpop.f32.mrb[13].mxu1 }
 0x10a   : > { %v1124_v17 = vpop.eup %1123  ;;  %v444_v18 = vadd.f32 %v1423_v46, %v443_v16 }
 0x10b   : > { %953 = vmatprep.mubr.f32.mxu1 %v1124_v17  ;;  %1133 = vtanh.f32 %v449_v15 }
 0x10c   : > { %954 = vmatmul.mubr.f32.gmra.mrb[22].mxu1 %v1122_v14  ;;  %1135 = vtanh.f32 %v444_v18  ;;  %v911_v19 = vpop.f32.mrb[14].mxu1 }
 0x10d   : > { %v1126_v20 = vpop.eup %1125  ;;  %v459_v21 = vadd.f32 %v911_v19, %v1423_v46  ;;  %v453_v22 = vpop.f32.mrb[15].mxu1 }
 0x10e   : > { %v1128_v23 = vpop.eup %1127  ;;  %v454_v24 = vadd.f32 %v1423_v46, %v453_v22 }
 0x10f   : > { %956 = vmatprep.mubr.f32.mxu1 %v1128_v23  ;;  %1137 = vtanh.f32 %v459_v21 }
 0x110   : > { %957 = vmatmul.mubr.f32.gmra.mrb[24].mxu1 %v1126_v20  ;;  %1139 = vtanh.f32 %v454_v24 }
 0x111   : > { %v1130_v25 = vpop.eup %1129 }
 0x112   : > { %v1132_v26 = vpop.eup %1131 }
 0x113   : > { %959 = vmatprep.mubr.f32.mxu1 %v1132_v26  ;;  %v261_v26 = vld [vmem:[%s1523_s3] sm:$0x1] }
 0x114   : > { %960 = vmatmul.mubr.f32.gmra.mrb[26].mxu1 %v1130_v25 }
 0x115   : > { %v1134_v27 = vpop.eup %1133 }
 0x116   : > { %v1136_v28 = vpop.eup %1135 }
 0x117   : > { %962 = vmatprep.mubr.f32.mxu1 %v1136_v28 }
 0x118   : > { %963 = vmatmul.mubr.f32.gmra.mrb[28].mxu1 %v1134_v27  ;;  %v644_v27 = vstv %s643_s7 }
 0x119   : > { %v1138_v29 = vpop.eup %1137 }
 0x11a   : > { %v1140_v30 = vpop.eup %1139 }
 0x11b   : > { %965 = vmatprep.mubr.f32.mxu1 %v1140_v30 }
 0x11c   : > { %966 = vmatmul.mubr.f32.gmra.mrb[30].mxu1 %v1138_v29 }
 0x1d3   : > { %v946_v34 = vpop.f32.mrb[16].mxu1 }
 0x1d4   : > { %v554_v35 = vadd.f32 %v946_v34, %v1445_v33  ;;  %v548_v36 = vpop.f32.mrb[17].mxu1 }
 0x1d5   : > { %v549_v37 = vadd.f32 %v1445_v33, %v548_v36 }
 0x1d6   : > { %1141 = vtanh.f32 %v554_v35 }
 0x1d7   : > { %1143 = vtanh.f32 %v549_v37  ;;  %v949_v38 = vpop.f32.mrb[18].mxu1 }
 0x1d8   : > { %v564_v39 = vadd.f32 %v949_v38, %v1445_v33  ;;  %v558_v40 = vpop.f32.mrb[19].mxu1 }
 0x1d9   : > { %v559_v41 = vadd.f32 %v1445_v33, %v558_v40 }
 0x1da   : > { %1145 = vtanh.f32 %v564_v39 }
 0x1db   : > { %1147 = vtanh.f32 %v559_v41  ;;  %v952_v42 = vpop.f32.mrb[20].mxu1 }
 0x1dc   : > { %v574_v43 = vadd.f32 %v952_v42, %v1445_v33  ;;  %v568_v44 = vpop.f32.mrb[21].mxu1 }
 0x1dd   : > { %v569_v45 = vadd.f32 %v1445_v33, %v568_v44 }
 0x1de   : > { %1149 = vtanh.f32 %v574_v43 }
 0x1df   : > { %1151 = vtanh.f32 %v569_v45  ;;  %v955_v46 = vpop.f32.mrb[22].mxu1 }
 0x1e0   : > { %v1142_v47 = vpop.eup %1141  ;;  %v584_v48 = vadd.f32 %v955_v46, %v1445_v33  ;;  %v578_v49 = vpop.f32.mrb[23].mxu1 }
 0x1e1   : > { %v1144_v50 = vpop.eup %1143  ;;  %v579_v51 = vadd.f32 %v1445_v33, %v578_v49 }
 0x1e2   : > { %v1044_v52 = vpack.c.bf16 %v1142_v47, %v1144_v50  ;;  %1153 = vtanh.f32 %v584_v48 }
 0x1e3   : > { %1155 = vtanh.f32 %v579_v51  ;;  %v958_v53 = vpop.f32.mrb[24].mxu1 }
 0x1e4   : > { %v1146_v54 = vpop.eup %1145  ;;  %1045 = vmatpush3.bf16.xpose.msra.mxu0 %v1044_v52  ;;  %v594_v55 = vadd.f32 %v958_v53, %v1445_v33  ;;  %v588_v56 = vpop.f32.mrb[25].mxu1 }
 0x1e5   : > { %v1148_v57 = vpop.eup %1147  ;;  %1046 = vmatprep.subr.bf16.mxu0 %v1237_v31  ;;  %v589_v58 = vadd.f32 %v1445_v33, %v588_v56 }
 0x1e6   : > { %v1047_v59 = vpack.c.bf16 %v1146_v54, %v1148_v57  ;;  %1157 = vtanh.f32 %v594_v55 }
 0x1e7   : > { %1159 = vtanh.f32 %v589_v58  ;;  %v961_v60 = vpop.f32.mrb[26].mxu1 }
 0x1e8   : > { %v1150_v61 = vpop.eup %1149  ;;  %v604_v62 = vadd.f32 %v961_v60, %v1445_v33  ;;  %v598_v63 = vpop.f32.mrb[27].mxu1 }
 0x1e9   : > { %v1152_v0 = vpop.eup %1151  ;;  %v599_v1 = vadd.f32 %v1445_v33, %v598_v63 }
 0x1ea   : > { %v1050_v2 = vpack.c.bf16 %v1150_v61, %v1152_v0  ;;  %1161 = vtanh.f32 %v604_v62 }
 0x1eb   : > { %1163 = vtanh.f32 %v599_v1  ;;  %v964_v3 = vpop.f32.mrb[28].mxu1 }
 0x1ec   : > { %v1154_v4 = vpop.eup %1153  ;;  %1048 = vmatpush3.bf16.xpose.msra.mxu0 %v1047_v59  ;;  %v614_v5 = vadd.f32 %v964_v3, %v1445_v33  ;;  %v608_v6 = vpop.f32.mrb[29].mxu1 }
 0x1ed   : > { %v1156_v7 = vpop.eup %1155  ;;  %1049 = vmatprep.subr.bf16.mxu0 %v1237_v31  ;;  %v609_v8 = vadd.f32 %v1445_v33, %v608_v6 }
 0x1ee   : > { %v1053_v9 = vpack.c.bf16 %v1154_v4, %v1156_v7  ;;  %1165 = vtanh.f32 %v614_v5 }
 0x1ef   : > { %1167 = vtanh.f32 %v609_v8  ;;  %v967_v10 = vpop.f32.mrb[30].mxu1 }
 0x1f0   : > { %v1158_v11 = vpop.eup %1157  ;;  %v624_v12 = vadd.f32 %v967_v10, %v1445_v33  ;;  %v618_v13 = vpop.f32.mrb[31].mxu1 }
 0x1f1   : > { %v1160_v14 = vpop.eup %1159  ;;  %v619_v15 = vadd.f32 %v1445_v33, %v618_v13 }
 0x1f2   : > { %v1056_v16 = vpack.c.bf16 %v1158_v11, %v1160_v14  ;;  %1169 = vtanh.f32 %v624_v12 }
 0x1f3   : > { %1171 = vtanh.f32 %v619_v15 }
 0x1f4   : > { %v1162_v17 = vpop.eup %1161  ;;  %1051 = vmatpush3.bf16.xpose.msra.mxu0 %v1050_v2 }
 0x1f5   : > { %v1164_v18 = vpop.eup %1163  ;;  %1052 = vmatprep.subr.bf16.mxu0 %v1237_v31 }
 0x1f6   : > { %v1059_v19 = vpack.c.bf16 %v1162_v17, %v1164_v18 }
 0x1f8   : > { %v1166_v20 = vpop.eup %1165 }
 0x1f9   : > { %v1168_v21 = vpop.eup %1167 }
 0x1fa   : > { %v1062_v22 = vpack.c.bf16 %v1166_v20, %v1168_v21 }
 0x1fc   : > { %v1170_v23 = vpop.eup %1169  ;;  %1054 = vmatpush3.bf16.xpose.msra.mxu0 %v1053_v9 }
 0x1fd   : > { %v1172_v24 = vpop.eup %1171  ;;  %1055 = vmatprep.subr.bf16.mxu0 %v1237_v31 }
 0x1fe   : > { %v1065_v25 = vpack.c.bf16 %v1170_v23, %v1172_v24 }
 0x204   : > { %1057 = vmatpush3.bf16.xpose.msra.mxu0 %v1056_v16 }
 0x205   : > { %1058 = vmatprep.subr.bf16.mxu0 %v1237_v31 }
 0x20c   : > { %1060 = vmatpush3.bf16.xpose.msra.mxu0 %v1059_v19 }
 0x20d   : > { %1061 = vmatprep.subr.bf16.mxu0 %v1237_v31 }
 0x214   : > { %1063 = vmatpush3.bf16.xpose.msra.mxu0 %v1062_v22 }
 0x215   : > { %1064 = vmatprep.subr.bf16.mxu0 %v1237_v31 }
 0x21c   : > { %1066 = vmatpush3.bf16.xpose.msra.mxu0 %v1065_v25 }
 0x223   : > { %1001 = vmatmul.mubr.f32.vlgmr.msra.gmra.mrb[0].mxu0 %v261_v26 }
 0x2f6   : > { %v711_v28 = vpop.f32.mrb[0].mxu0 }
 0x2f7   : > { %v712_v29 = vadd.f32 %v711_v28, %v644_v27  ;;  %v1002_v30 = vpop.f32.mrb[1].mxu0 }
 0x2f9   : > { %715 = vst [vmem:[%s218_s9] sm:$0x1] %v712_v29 }
 0x2fa   : > { %1186 = shalt.err (!%p1183_p3)
}
 0x2fb   : > { %s1187_s12 = scalar_lea.hbm %s1478_s14, 16  ;;  %s1191_s24 = scalar_lea.hbm %s1525_s5, 32 }
 0x2fc   : > { %p1188_p4 = scmp.ne.s32.totalorder %s1478_s14, %s1187_s12  ;;  %p1192_p9 = scmp.lt.u32.totalorder %s1478_s14, %s1525_s5 }
 0x2fd   : > { %p1193_p10 = scmp.lt.u32.totalorder %s1191_s24, %s1187_s12  ;;  %p1195_p12 = scmp.lt.u32.totalorder %s1187_s12, %s1478_s14 }
 0x2fe   : > { %p1189_p7 = pnand %p1188_p4, %p1309_p5 }
 0x2ff   : > { %p1194_p11 = por %p1193_p10, %p1192_p9 }
 0x300   : > { %p1190_p8 = pneg %p1189_p7 }
 0x301   : > { %p1196_p13 = por %p1195_p12, %p1194_p11 }
 0x303   : > { %p1197_p0 = pnand %p1196_p13, %p1190_p8 }
 0x305   : > { %1200 = shalt.err (!%p1197_p0)
}
 0x306   : > { %1067 = dma.vmem_to_hbm [thread:$0]  (%p1309_p5), %s1480_s10, 16, %s1478_s14, %s717_s27  }
 0x307 PF: > { %p1073_p1 = scmp.ge.s32.totalorder %s1235_s23, 2  ;;  %s741_s7 = sand.u32 1, %s1223_s20  }
 0x308   : > { %s742_s8 = scalar_lea.sflag [#allocation4], %s741_s7 }
 0x309   : > { %p1070_p2 = pnand %p1073_p1, %p1313_p6 }
 0x30b   : > { %1218 = dma.done.wait (!%p1070_p2), %s742_s8, 16  }
 0x30c   : > { %1220 = vsyncadd (!%p1070_p2), %s742_s8, 4294967280  ;;  %p16_p3 = scmp.ge.s32.totalorder %s1297_s25, 4   ;;  %s1528_s20 = smov %s1227_s21 }
 0x30d   : > { %s1529_s21 = smov %s1231_s22  ;;  %s1530_s22 = smov %s1307_s28 }
 0x30e   : > { %s1531_s23 = smov %s1297_s25  ;;  %18 = sbr.rel (!%p16_p3) target bundleno = 5 (0x5), region = 75 }
 0x315   :  { %746 = vsyncpa [#allocation4], 1 }
 0x316   :  { %748 = vsyncpa [#allocation4 + $0x1], 1 }

</bundles_post_ra>
